<compile_context>
chip_gen: v7x
topology: tpu7x:2x2x1
jax: 0.10.0
libtpu: 0.0.40
codegen_flags: <defaults>
</compile_context>

<pallas_src>
import jax
import jax.numpy as jnp
import numpy as np
from jax import lax
from jax.experimental import pallas as pl
from jax.experimental.pallas import tpu as pltpu


def _make_kernel(T, B, H, G, n_pad):
    """Build the kernel with static T (steps), B (rows/step), H, G=4H, n_pad (tag lanes)."""

    def kernel(pre0_ref,      # (T*B, G)  layer-0 pre-gates (gathered fused-emb table)
               wslab_ref,     # (4H+2, W) packed weights/biases, W = max(G, n_pad)
               out_ref,       # (T*B, n_pad) padded logits
               pre_scr,       # (T*B, G)  layer-1 pre-gates scratch
               seq_scr):      # (T*B, H)  per-layer sequence output scratch
        # ---- one-time unpack of the packed weight slab (static ref slices) ----
        # bf16 only for the latency-critical in-loop h @ W_hh matmuls; f32 elsewhere.
        whh0 = wslab_ref[0 * H:1 * H, 0:G].astype(jnp.bfloat16)
        wih1 = wslab_ref[1 * H:2 * H, 0:G]
        whh1 = wslab_ref[2 * H:3 * H, 0:G].astype(jnp.bfloat16)
        wtag = wslab_ref[3 * H:4 * H, 0:n_pad]
        b1 = wslab_ref[4 * H:4 * H + 1, 0:G]
        btag = wslab_ref[4 * H + 1:4 * H + 2, 0:n_pad]

        def lstm_layer(pre_ref, whh_bf16):
            def nonlin(gates):
                # Lane-dense nonlinearities on the full (B, 4H=128) tensor, then slice.
                sig = jax.nn.sigmoid(gates)
                th = jnp.tanh(gates)
                return (sig[:, 0:H], sig[:, H:2 * H],
                        th[:, 2 * H:3 * H], sig[:, 3 * H:4 * H])

            # ---- peeled t = 0: h0 = c0 = 0 => gates = pre[0], c = i*g (no MXU) ----
            i0, _f0, g0, o0 = nonlin(pre_ref[0:B, :])
            c = i0 * g0
            h = o0 * jnp.tanh(c)
            seq_scr[0:B, :] = h

            # ---- remaining steps: (h, c) carried in registers; only h@Whh on MXU ----
            def step(t, carry):
                h, c = carry
                row = pl.multiple_of(t * B, B)
                gates = pre_ref[pl.ds(row, B), :] + jnp.dot(
                    h.astype(jnp.bfloat16), whh_bf16,
                    preferred_element_type=jnp.float32)
                i, f, g, o = nonlin(gates)
                c = f * c + i * g
                h = o * jnp.tanh(c)
                seq_scr[pl.ds(row, B), :] = h
                return (h, c)

            # T is small & static: fully unroll so successive steps can overlap.
            lax.fori_loop(1, T, step, (h, c), unroll=True)

        # ---------------- layer 0 (pre-gates come straight from the input ref) --------
        lstm_layer(pre0_ref, whh0)

        # ---------------- layer 1: batched input projection, then recurrence ----------
        pre_scr[...] = jnp.dot(seq_scr[...], wih1,
                               preferred_element_type=jnp.float32) + b1
        lstm_layer(pre_scr, whh1)

        # ---------------- hidden2tag head: one matmul, one lane-dense 128-wide store --
        out_ref[...] = jnp.dot(seq_scr[...], wtag,
                               preferred_element_type=jnp.float32) + btag

    return kernel


def init_params(key, vocab_size, embed_dim, hidden_dim, tagset_size):
    """Deterministic synthetic parameters matching the PyTorch module's shapes."""
    ks = jax.random.split(key, 12)
    s = 0.1
    emb = jax.random.normal(ks[0], (vocab_size, embed_dim), jnp.float32) * s
    emb = emb.at[0].set(0.0)  # padding_idx=0 row
    H = hidden_dim
    return {
        'embeddings': emb,
        # layer 0 (input_size = embed_dim)
        'w_ih0': jax.random.normal(ks[1], (4 * H, embed_dim), jnp.float32) * s,
        'w_hh0': jax.random.normal(ks[2], (4 * H, H), jnp.float32) * s,
        'b_ih0': jax.random.normal(ks[3], (4 * H,), jnp.float32) * s,
        'b_hh0': jax.random.normal(ks[4], (4 * H,), jnp.float32) * s,
        # layer 1 (input_size = hidden_dim)
        'w_ih1': jax.random.normal(ks[5], (4 * H, H), jnp.float32) * s,
        'w_hh1': jax.random.normal(ks[6], (4 * H, H), jnp.float32) * s,
        'b_ih1': jax.random.normal(ks[7], (4 * H,), jnp.float32) * s,
        'b_hh1': jax.random.normal(ks[8], (4 * H,), jnp.float32) * s,
        # hidden2tag
        'w_tag': jax.random.normal(ks[9], (tagset_size, H), jnp.float32) * s,
        'b_tag': jax.random.normal(ks[10], (tagset_size,), jnp.float32) * s,
    }


def pos_tagger_forward(input_seq, params):
    """Pallas implementation of POSTagger.forward (recurrence over axis 0, as in torch)."""
    T, B = input_seq.shape
    H = params['w_hh0'].shape[1]
    G = 4 * H
    tagset = params['w_tag'].shape[0]
    n_pad = 128 * pl.cdiv(tagset, 128)   # lane-dense output width
    W = max(G, n_pad)                    # common lane width of the packed slab

    # Fuse embedding lookup with the layer-0 input projection + both layer-0 biases:
    # one (vocab, 4H) table, gathered per token -> layer-0 pre-gates directly.
    emb_pre0 = (params['embeddings'] @ params['w_ih0'].T
                + params['b_ih0'] + params['b_hh0'])                     # (V, 4H)
    pre0 = jnp.take(emb_pre0, input_seq.reshape(-1), axis=0)             # (T*B, 4H)
    # TODO(synk): at realistic vocab/seq sizes, move this gather into the kernel via
    # scalar-prefetched token ids + row DMA instead of an XLA gather in the wrapper.

    def padw(a):
        a = a.astype(jnp.float32)
        return a if a.shape[1] == W else jnp.pad(a, ((0, 0), (0, W - a.shape[1])))

    wtag = jnp.zeros((H, n_pad), jnp.float32).at[:, :tagset].set(params['w_tag'].T)
    btag = jnp.zeros((1, n_pad), jnp.float32).at[:, :tagset].set(params['b_tag'])
    b1 = (params['b_ih1'] + params['b_hh1']).reshape(1, G)
    # One packed (4H+2, W) weight slab -> a single HBM->VMEM DMA at kernel start.
    wslab = jnp.concatenate(
        [padw(params['w_hh0'].T), padw(params['w_ih1'].T), padw(params['w_hh1'].T),
         padw(wtag), padw(b1), padw(btag)], axis=0)

    vmem = pl.BlockSpec(memory_space=pltpu.MemorySpace.VMEM)
    # NOTE: at these sizes a single grid-less call is right; on v7x with larger batches,
    # add a leading "parallel" grid axis over rows to use the second TensorCore.
    out2d = pl.pallas_call(
        _make_kernel(T, B, H, G, n_pad),
        out_shape=jax.ShapeDtypeStruct((T * B, n_pad), jnp.float32),
        in_specs=[vmem, vmem],
        out_specs=vmem,
        scratch_shapes=[
            pltpu.VMEM((T * B, G), jnp.float32),   # layer-1 pre-gates
            pltpu.VMEM((T * B, H), jnp.float32),   # per-layer sequence output
        ],
    )(pre0.astype(jnp.float32), wslab)
    return out2d.reshape(T, B, n_pad)[..., :tagset]


def reference_forward(input_seq, p):
    """Pure-JAX f32 reference mirroring torch semantics (for correctness check)."""
    x = jnp.take(p['embeddings'], input_seq, axis=0)
    for l in range(2):
        wih, whh = p[f'w_ih{l}'], p[f'w_hh{l}']
        bih, bhh = p[f'b_ih{l}'], p[f'b_hh{l}']
        T, B, _ = x.shape
        H = whh.shape[1]
        h = jnp.zeros((B, H), jnp.float32)
        c = jnp.zeros((B, H), jnp.float32)
        outs = []
        for t in range(T):
            gates = x[t] @ wih.T + bih + h @ whh.T + bhh
            i = jax.nn.sigmoid(gates[:, :H])
            f = jax.nn.sigmoid(gates[:, H:2 * H])
            g = jnp.tanh(gates[:, 2 * H:3 * H])
            o = jax.nn.sigmoid(gates[:, 3 * H:])
            c = f * c + i * g
            h = o * jnp.tanh(c)
            outs.append(h)
        x = jnp.stack(outs, axis=0)
    return x @ p['w_tag'].T + p['b_tag']


if __name__ == "__main__":
    # Small, deterministic configuration consistent with the module's __init__.
    vocab_size = 20
    embed_dim = 16
    hidden_dim = 32
    tagset_size = 8
    batch, seq_len = 2, 8   # input_seq shape (batch, seq_len) as in evaluate()

    key = jax.random.PRNGKey(0)
    pkey, dkey = jax.random.split(key)
    params = init_params(pkey, vocab_size, embed_dim, hidden_dim, tagset_size)

    input_seq = jax.random.randint(dkey, (batch, seq_len), 1, vocab_size, dtype=jnp.int32)
    input_seq = input_seq.at[:, -2:].set(0)  # a couple of padding tokens

    logits = pos_tagger_forward(input_seq, params)
    logits = jax.block_until_ready(logits)

    ref = reference_forward(input_seq, params)
    # Slightly loosened tolerance: the in-loop h @ W_hh matmul uses bf16 MXU inputs
    # (f32 accumulation); everything else is f32.
    np.testing.assert_allclose(np.asarray(logits), np.asarray(ref), rtol=1e-2, atol=5e-3)

    print("KERNEL_OK")
</pallas_src>

<mosaic_0001>
module attributes {stable_mosaic.version = 11 : i64} {
  func.func @kernel(%arg0: memref<16x128xf32, #tpu.memory_space<vmem>>, %arg1: memref<130x128xf32, #tpu.memory_space<vmem>>, %arg2: memref<16x128xf32, #tpu.memory_space<vmem>>, %arg3: memref<16x128xf32, #tpu.memory_space<vmem>>, %arg4: memref<16x32xf32, #tpu.memory_space<vmem>>) attributes {dimension_semantics = [], scalar_prefetch = 0 : i64, scratch_operands = 2 : i64, tpu.core_type = #tpu.core_type<tc>} {
    %c0 = arith.constant 0 : index
    %c0_0 = arith.constant 0 : index
    %0 = vector.load %arg1[%c0, %c0_0] : memref<130x128xf32, #tpu.memory_space<vmem>>, vector<32x128xf32>
    %1 = arith.truncf %0 : vector<32x128xf32> to vector<32x128xbf16>
    %c32 = arith.constant 32 : index
    %c0_1 = arith.constant 0 : index
    %2 = vector.load %arg1[%c32, %c0_1] : memref<130x128xf32, #tpu.memory_space<vmem>>, vector<32x128xf32>
    %c64 = arith.constant 64 : index
    %c0_2 = arith.constant 0 : index
    %3 = vector.load %arg1[%c64, %c0_2] : memref<130x128xf32, #tpu.memory_space<vmem>>, vector<32x128xf32>
    %4 = arith.truncf %3 : vector<32x128xf32> to vector<32x128xbf16>
    %c96 = arith.constant 96 : index
    %c0_3 = arith.constant 0 : index
    %5 = vector.load %arg1[%c96, %c0_3] : memref<130x128xf32, #tpu.memory_space<vmem>>, vector<32x128xf32>
    %c128 = arith.constant 128 : index
    %c0_4 = arith.constant 0 : index
    %6 = vector.load %arg1[%c128, %c0_4] : memref<130x128xf32, #tpu.memory_space<vmem>>, vector<1x128xf32>
    %c129 = arith.constant 129 : index
    %c0_5 = arith.constant 0 : index
    %7 = vector.load %arg1[%c129, %c0_5] : memref<130x128xf32, #tpu.memory_space<vmem>>, vector<1x128xf32>
    %c0_6 = arith.constant 0 : index
    %c0_7 = arith.constant 0 : index
    %8 = vector.load %arg0[%c0_6, %c0_7] : memref<16x128xf32, #tpu.memory_space<vmem>>, vector<8x128xf32>
    %9 = arith.negf %8 : vector<8x128xf32>
    %10 = math.exp %9 : vector<8x128xf32>
    %cst = arith.constant 1.000000e+00 : f32
    %11 = vector.broadcast %cst : f32 to vector<8x128xf32>
    %12 = arith.addf %11, %10 : vector<8x128xf32>
    %13 = arith.divf %11, %12 : vector<8x128xf32>
    %14 = math.tanh %8 : vector<8x128xf32>
    %15 = vector.extract_strided_slice %13 {offsets = [0, 0], sizes = [8, 32], strides = [1, 1]} : vector<8x128xf32> to vector<8x32xf32>
    %16 = vector.extract_strided_slice %14 {offsets = [0, 64], sizes = [8, 32], strides = [1, 1]} : vector<8x128xf32> to vector<8x32xf32>
    %17 = vector.extract_strided_slice %13 {offsets = [0, 96], sizes = [8, 32], strides = [1, 1]} : vector<8x128xf32> to vector<8x32xf32>
    %18 = arith.mulf %15, %16 : vector<8x32xf32>
    %19 = math.tanh %18 : vector<8x32xf32>
    %20 = arith.mulf %17, %19 : vector<8x32xf32>
    %c0_8 = arith.constant 0 : index
    %c0_9 = arith.constant 0 : index
    %21 = vector.load %arg4[%c0_8, %c0_9] : memref<16x32xf32, #tpu.memory_space<vmem>>, vector<8x32xf32>
    tpu.vector_store %arg4[%c0_8, %c0_9], %20 {strides = array<i32>} : memref<16x32xf32, #tpu.memory_space<vmem>>, vector<8x32xf32>,
    %c1_i32 = arith.constant 1 : i32
    %c8_i32 = arith.constant 8 : i32
    %22 = arith.muli %c1_i32, %c8_i32 : i32
    %23 = tpu.assume_multiple %22, 8 : i32
    %24 = arith.index_cast %23 : i32 to index
    %c0_10 = arith.constant 0 : index
    %25 = vector.load %arg0[%24, %c0_10] : memref<16x128xf32, #tpu.memory_space<vmem>>, vector<8x128xf32>
    %26 = arith.truncf %20 : vector<8x32xf32> to vector<8x32xbf16>
    %cst_11 = arith.constant dense<0.000000e+00> : vector<8x128xf32>
    %27 = tpu.matmul %26, %1, %cst_11 {dimension_numbers = #tpu.dot_dimension_numbers<[1], [0], [0], [1], [0, 0, 1, 1], [], []>} : vector<8x32xbf16>, vector<32x128xbf16>, vector<8x128xf32> -> vector<8x128xf32>
    %28 = arith.addf %25, %27 : vector<8x128xf32>
    %29 = arith.negf %28 : vector<8x128xf32>
    %30 = math.exp %29 : vector<8x128xf32>
    %cst_12 = arith.constant 1.000000e+00 : f32
    %31 = vector.broadcast %cst_12 : f32 to vector<8x128xf32>
    %32 = arith.addf %31, %30 : vector<8x128xf32>
    %33 = arith.divf %31, %32 : vector<8x128xf32>
    %34 = math.tanh %28 : vector<8x128xf32>
    %35 = vector.extract_strided_slice %33 {offsets = [0, 0], sizes = [8, 32], strides = [1, 1]} : vector<8x128xf32> to vector<8x32xf32>
    %36 = vector.extract_strided_slice %33 {offsets = [0, 32], sizes = [8, 32], strides = [1, 1]} : vector<8x128xf32> to vector<8x32xf32>
    %37 = vector.extract_strided_slice %34 {offsets = [0, 64], sizes = [8, 32], strides = [1, 1]} : vector<8x128xf32> to vector<8x32xf32>
    %38 = vector.extract_strided_slice %33 {offsets = [0, 96], sizes = [8, 32], strides = [1, 1]} : vector<8x128xf32> to vector<8x32xf32>
    %39 = arith.mulf %36, %18 : vector<8x32xf32>
    %40 = arith.mulf %35, %37 : vector<8x32xf32>
    %41 = arith.addf %39, %40 : vector<8x32xf32>
    %42 = math.tanh %41 : vector<8x32xf32>
    %43 = arith.mulf %38, %42 : vector<8x32xf32>
    %44 = arith.index_cast %23 : i32 to index
    %c0_13 = arith.constant 0 : index
    %45 = vector.load %arg4[%44, %c0_13] : memref<16x32xf32, #tpu.memory_space<vmem>>, vector<8x32xf32>
    tpu.vector_store %arg4[%44, %c0_13], %43 {strides = array<i32>} : memref<16x32xf32, #tpu.memory_space<vmem>>, vector<8x32xf32>,
    %c1_i32_14 = arith.constant 1 : i32
    %c0_15 = arith.constant 0 : index
    %c0_16 = arith.constant 0 : index
    %46 = vector.load %arg4[%c0_15, %c0_16] : memref<16x32xf32, #tpu.memory_space<vmem>>, vector<16x32xf32>
    %cst_17 = arith.constant dense<0.000000e+00> : vector<16x128xf32>
    %47 = tpu.matmul %46, %2, %cst_17 {dimension_numbers = #tpu.dot_dimension_numbers<[1], [0], [0], [1], [0, 0, 1, 1], [], []>} : vector<16x32xf32>, vector<32x128xf32>, vector<16x128xf32> -> vector<16x128xf32>
    %48 = vector.broadcast %6 : vector<1x128xf32> to vector<16x128xf32>
    %49 = arith.addf %47, %48 : vector<16x128xf32>
    %c0_18 = arith.constant 0 : index
    %c0_19 = arith.constant 0 : index
    %50 = vector.load %arg3[%c0_18, %c0_19] : memref<16x128xf32, #tpu.memory_space<vmem>>, vector<16x128xf32>
    tpu.vector_store %arg3[%c0_18, %c0_19], %49 {strides = array<i32>} : memref<16x128xf32, #tpu.memory_space<vmem>>, vector<16x128xf32>,
    %c0_20 = arith.constant 0 : index
    %c0_21 = arith.constant 0 : index
    %51 = vector.load %arg3[%c0_20, %c0_21] : memref<16x128xf32, #tpu.memory_space<vmem>>, vector<8x128xf32>
    %52 = arith.negf %51 : vector<8x128xf32>
    %53 = math.exp %52 : vector<8x128xf32>
    %cst_22 = arith.constant 1.000000e+00 : f32
    %54 = vector.broadcast %cst_22 : f32 to vector<8x128xf32>
    %55 = arith.addf %54, %53 : vector<8x128xf32>
    %56 = arith.divf %54, %55 : vector<8x128xf32>
    %57 = math.tanh %51 : vector<8x128xf32>
    %58 = vector.extract_strided_slice %56 {offsets = [0, 0], sizes = [8, 32], strides = [1, 1]} : vector<8x128xf32> to vector<8x32xf32>
    %59 = vector.extract_strided_slice %57 {offsets = [0, 64], sizes = [8, 32], strides = [1, 1]} : vector<8x128xf32> to vector<8x32xf32>
    %60 = vector.extract_strided_slice %56 {offsets = [0, 96], sizes = [8, 32], strides = [1, 1]} : vector<8x128xf32> to vector<8x32xf32>
    %61 = arith.mulf %58, %59 : vector<8x32xf32>
    %62 = math.tanh %61 : vector<8x32xf32>
    %63 = arith.mulf %60, %62 : vector<8x32xf32>
    %c0_23 = arith.constant 0 : index
    %c0_24 = arith.constant 0 : index
    %64 = vector.load %arg4[%c0_23, %c0_24] : memref<16x32xf32, #tpu.memory_space<vmem>>, vector<8x32xf32>
    tpu.vector_store %arg4[%c0_23, %c0_24], %63 {strides = array<i32>} : memref<16x32xf32, #tpu.memory_space<vmem>>, vector<8x32xf32>,
    %c1_i32_25 = arith.constant 1 : i32
    %c8_i32_26 = arith.constant 8 : i32
    %65 = arith.muli %c1_i32_25, %c8_i32_26 : i32
    %66 = tpu.assume_multiple %65, 8 : i32
    %67 = arith.index_cast %66 : i32 to index
    %c0_27 = arith.constant 0 : index
    %68 = vector.load %arg3[%67, %c0_27] : memref<16x128xf32, #tpu.memory_space<vmem>>, vector<8x128xf32>
    %69 = arith.truncf %63 : vector<8x32xf32> to vector<8x32xbf16>
    %cst_28 = arith.constant dense<0.000000e+00> : vector<8x128xf32>
    %70 = tpu.matmul %69, %4, %cst_28 {dimension_numbers = #tpu.dot_dimension_numbers<[1], [0], [0], [1], [0, 0, 1, 1], [], []>} : vector<8x32xbf16>, vector<32x128xbf16>, vector<8x128xf32> -> vector<8x128xf32>
    %71 = arith.addf %68, %70 : vector<8x128xf32>
    %72 = arith.negf %71 : vector<8x128xf32>
    %73 = math.exp %72 : vector<8x128xf32>
    %cst_29 = arith.constant 1.000000e+00 : f32
    %74 = vector.broadcast %cst_29 : f32 to vector<8x128xf32>
    %75 = arith.addf %74, %73 : vector<8x128xf32>
    %76 = arith.divf %74, %75 : vector<8x128xf32>
    %77 = math.tanh %71 : vector<8x128xf32>
    %78 = vector.extract_strided_slice %76 {offsets = [0, 0], sizes = [8, 32], strides = [1, 1]} : vector<8x128xf32> to vector<8x32xf32>
    %79 = vector.extract_strided_slice %76 {offsets = [0, 32], sizes = [8, 32], strides = [1, 1]} : vector<8x128xf32> to vector<8x32xf32>
    %80 = vector.extract_strided_slice %77 {offsets = [0, 64], sizes = [8, 32], strides = [1, 1]} : vector<8x128xf32> to vector<8x32xf32>
    %81 = vector.extract_strided_slice %76 {offsets = [0, 96], sizes = [8, 32], strides = [1, 1]} : vector<8x128xf32> to vector<8x32xf32>
    %82 = arith.mulf %79, %61 : vector<8x32xf32>
    %83 = arith.mulf %78, %80 : vector<8x32xf32>
    %84 = arith.addf %82, %83 : vector<8x32xf32>
    %85 = math.tanh %84 : vector<8x32xf32>
    %86 = arith.mulf %81, %85 : vector<8x32xf32>
    %87 = arith.index_cast %66 : i32 to index
    %c0_30 = arith.constant 0 : index
    %88 = vector.load %arg4[%87, %c0_30] : memref<16x32xf32, #tpu.memory_space<vmem>>, vector<8x32xf32>
    tpu.vector_store %arg4[%87, %c0_30], %86 {strides = array<i32>} : memref<16x32xf32, #tpu.memory_space<vmem>>, vector<8x32xf32>,
    %c1_i32_31 = arith.constant 1 : i32
    %c0_32 = arith.constant 0 : index
    %c0_33 = arith.constant 0 : index
    %89 = vector.load %arg4[%c0_32, %c0_33] : memref<16x32xf32, #tpu.memory_space<vmem>>, vector<16x32xf32>
    %cst_34 = arith.constant dense<0.000000e+00> : vector<16x128xf32>
    %90 = tpu.matmul %89, %5, %cst_34 {dimension_numbers = #tpu.dot_dimension_numbers<[1], [0], [0], [1], [0, 0, 1, 1], [], []>} : vector<16x32xf32>, vector<32x128xf32>, vector<16x128xf32> -> vector<16x128xf32>
    %91 = vector.broadcast %7 : vector<1x128xf32> to vector<16x128xf32>
    %92 = arith.addf %90, %91 : vector<16x128xf32>
    %c0_35 = arith.constant 0 : index
    %c0_36 = arith.constant 0 : index
    %93 = vector.load %arg2[%c0_35, %c0_36] : memref<16x128xf32, #tpu.memory_space<vmem>>, vector<16x128xf32>
    tpu.vector_store %arg2[%c0_35, %c0_36], %92 {strides = array<i32>} : memref<16x128xf32, #tpu.memory_space<vmem>>, vector<16x128xf32>,
    return
  }
}

</mosaic_0001>

<bundles_post_ra>
// kernel: tpu_custom_call.1
= control target key start
LH: loop header
LB: loop body
LE: loop exit
PB: predicated region body
PF: predicated region fallthrough
CT: control target
= control target key end

     0   :  { %7 = vsyncpa [#allocation5], 0  ;;  %s779_s0 = inlined_call_operand.hbm [shape: f32[16,128], index: 0, kind: input, shape index: {}]   ;;  %s780_s1 = inlined_call_operand.hbm [shape: f32[130,128], index: 1, kind: input, shape index: {}]   ;;  %s781_s2 = inlined_call_operand.hbm [shape: f32[16,128], index: 2, kind: output, shape index: {}]  }
   0x1   :  { %8 = vsyncpa [#allocation8], 0 }
   0x2   :  { %9 = vsyncpa [#allocation6], 0  ;;  %s673_s9 = smov [#allocation4]   ;;  %s601_s13 = scalar_lea.hbm %s779_s0, 256 }
   0x3   :  { %s15_s10 = sshll.u32 %s673_s9, 4  ;;  %p602_p0 = scmp.ne.s32.totalorder %s779_s0, %s601_s13  ;;  %s16_s10 = int_to_ptr.vmem [resolvable:$true] %s15_s10 }
   0x4   :  { %p605_p1 = scmp.lt.u32.totalorder %s601_s13, %s779_s0 }
   0x6   :  { %p607_p2 = pnand %p605_p1, %p602_p0 }
   0x8   :  { %610 = shalt.err (!%p607_p2)
}
   0x9   :  { %s611_s18 = scalar_lea.vmem %s16_s10, 256  ;;  %p616_p4 = scmp.lt.s32.totalorder %s16_s10, %s16_s10 }
   0xa   :  { %p612_p3 = scmp.ne.s32.totalorder %s16_s10, %s611_s18  ;;  %p617_p5 = scmp.lt.s32.totalorder %s611_s18, %s611_s18 }
   0xc   :  { %p618_p6 = por %p617_p5, %p616_p4 }
   0xe   :  { %p619_p7 = pnand %p618_p6, %p612_p3 }
  0x10   :  { %622 = shalt.err (!%p619_p7)
}
  0x11   :  { %s674_s19 = smov 128   ;;  %s675_s20 = smov 8  }
  0x12   :  { %21 = dma.hbm_to_vmem [thread:$0]  %s779_s0, 256, %s16_s10, [#allocation5], %s674_s19, %s674_s19, %s675_s20  }
  0x13   :  { %s676_s23 = smov [#allocation7]   ;;  %s623_s27 = scalar_lea.hbm %s780_s1, 2176 }
  0x14   :  { %s27_s24 = sshll.u32 %s676_s23, 4  ;;  %p624_p8 = scmp.ne.s32.totalorder %s780_s1, %s623_s27  ;;  %s28_s24 = int_to_ptr.vmem [resolvable:$true] %s27_s24 }
  0x15   :  { %p627_p9 = scmp.lt.u32.totalorder %s623_s27, %s780_s1 }
  0x17   :  { %p629_p10 = pnand %p627_p9, %p624_p8 }
  0x19   :  { %632 = shalt.err (!%p629_p10)
}
  0x1a   :  { %s633_s4 = scalar_lea.vmem %s28_s24, 2176  ;;  %p638_p12 = scmp.lt.s32.totalorder %s28_s24, %s28_s24 }
  0x1b   :  { %p634_p11 = scmp.ne.s32.totalorder %s28_s24, %s633_s4  ;;  %p639_p13 = scmp.lt.s32.totalorder %s633_s4, %s633_s4 }
  0x1d   :  { %p640_p0 = por %p639_p13, %p638_p12 }
  0x1f   :  { %p641_p1 = pnand %p640_p0, %p634_p11 }
  0x21   :  { %644 = shalt.err (!%p641_p1)
}
  0x22   :  { %33 = dma.hbm_to_vmem [thread:$0]  %s780_s1, 2176, %s28_s24, [#allocation8], %s674_s19, %s674_s19, %s675_s20  }
  0x23   :  { %667 = dma.done.wait [#allocation5], 256  }
  0x24   :  { %668 = vsyncadd [#allocation5], 4294967040 }
  0x25   :  { %669 = dma.done.wait [#allocation8], 2176  }
  0x26   :  { %670 = vsyncadd [#allocation8], 4294965120  ;;  %v63_v0 = vld [vmem:[#allocation4] sm:$0xff]  ;;  %s677_s6 = smov 64   ;;  %v41_v8 = vld [vmem:[#allocation7] sm:$0xff]  ;;  %v678_v11 = vmov 0.0  }
  0x27   :  { %569 = vtanh.f32 %v63_v0  ;;  %v475_v2 = vmul.f32 -1.442695, %v63_v0  ;;  %v42_v9 = vld [vmem:[#allocation7 + $0x8] sm:$0xff]  ;;  %v43_v10 = vld [vmem:[#allocation7 + $0x10] sm:$0xff]  ;;  %505 = vmatprep.subr.bf16.mxu0 %v678_v11  ;;  %v44_v13 = vld [vmem:[#allocation7 + $0x18] sm:$0xff]  ;;  %vm679_vm0 = vmmov 0  }
  0x28   :  { %v45_v12 = vpack.c.bf16 %v42_v9, %v41_v8  ;;  %509 = vmatprep.mubr.msk.bf16.mxu0 %vm679_vm0, %v678_v11  ;;  %v46_v14 = vpack.c.bf16 %v44_v13, %v43_v10  ;;  %s680_s1 = smov 96   ;;  %s681_s7 = smov 32   ;;  %vm86_vm1 = vcmask 261120   ;;  %v89_v20 = vld [vmem:[#allocation4 + $0x8] sm:$0xff]  ;;  %v47_v40 = vld [vmem:[#allocation7 + $0x20] sm:$0xff]  ;;  %v48_v41 = vld [vmem:[#allocation7 + $0x28] sm:$0xff] }
  0x29   :  { %571 = vpow2.f32 %v475_v2  ;;  %v543_v42 = vpack.c.bf16 %v48_v41, %v47_v40  ;;  %v49_v43 = vld [vmem:[#allocation7 + $0x30] sm:$0xff]  ;;  %v50_v44 = vld [vmem:[#allocation7 + $0x38] sm:$0xff]  ;;  %v478_v50 = vld [vmem:[#allocation7 + $0x80] ss:$0 sm:$0xff]  ;;  %s682_s8 = smov [#allocation9]  }
  0x2a   :  { %506 = vmatpush3.bf16.msra.mxu0 %v45_v12  ;;  %v547_v45 = vpack.c.bf16 %v50_v44, %v49_v43  ;;  %v51_v62 = vld [vmem:[#allocation7 + $0x40] sm:$0xff]  ;;  %v52_v63 = vld [vmem:[#allocation7 + $0x48] sm:$0xff]  ;;  %v53_v0 = vld [vmem:[#allocation7 + $0x50] sm:$0xff]  ;;  %s462_s9 = sshll.u32 %s682_s8, 4  ;;  %s463_s9 = int_to_ptr.vmem [resolvable:$true] %s462_s9 }
  0x2b   :  { %507 = vmatprep.subr.bf16.mxu0 %v678_v11  ;;  %544 = vmatprep.subr.bf16.mxu1 %v543_v42  ;;  %v54_v2 = vld [vmem:[#allocation7 + $0x58] sm:$0xff]  ;;  %s645_s10 = scalar_lea.vmem %s463_s9, 256  ;;  %p650_p3 = scmp.lt.s32.totalorder %s463_s9, %s463_s9 }
  0x2c   :  { %546 = vmatpush3.bf16.msra.mxu1 %v543_v42  ;;  %p646_p2 = scmp.ne.s32.totalorder %s463_s9, %s645_s10  ;;  %p651_p4 = scmp.lt.s32.totalorder %s645_s10, %s645_s10 }
  0x2d   :  { %548 = vmatprep.subr.bf16.mxu1 %v547_v45 }
  0x2e   :  { %508 = vmatpush3.bf16.msra.mxu0 %v46_v14  ;;  %p652_p5 = por %p651_p4, %p650_p3 }
  0x2f   :  { %524 = vmatprep.subr.bf16.mxu0 %v678_v11 }
  0x30   :  { %550 = vmatpush3.bf16.msra.mxu1 %v547_v45  ;;  %p653_p6 = pnand %p652_p5, %p646_p2 }
  0x31   :  { %v570_v1 = vpop.eup %569 }
  0x32   :  { %72 = vrot.lane.b32.xlu0 %v570_v1, %s677_s6  ;;  %v55_v1 = vpack.c.bf16 %v52_v63, %v51_v62 }
  0x33   :  { %v572_v3 = vpop.eup %571 }
  0x34   :  { %v67_v4 = vadd.f32 1.0, %v572_v3  ;;  %v56_v3 = vpack.c.bf16 %v54_v2, %v53_v0 }
  0x36   :  { %573 = vrcp.f32 %v67_v4 }
  0x40   :  { %v574_v5 = vpop.eup %573 }
  0xa4   :  { %v73_v6 = vpop.permute.xlu0 %72 }
  0xa5   :  { %v75_v7 = vmul.f32 %v574_v5, %v73_v6 }
  0xa7   :  { %575 = vtanh.f32 %v75_v7 }
  0xb1   :  { %v576_v15 = vpop.eup %575 }
  0xb2   :  { %78 = vrot.lane.b32.xlu0 %v576_v15, %s680_s1 }
  0xb6   :  { %146 = vrot.lane.b32.xlu0 %v75_v7, %s681_s7 }
 0x124   :  { %v79_v16 = vpop.permute.xlu0 %78 }
 0x125   :  { %v81_v17 = vmul.f32 %v574_v5, %v79_v16 }
 0x127   :  { %v90_v18 = vpack.c.bf16 %v81_v17, %v81_v17 }
 0x128   :  { %v147_v33 = vpop.permute.xlu0 %146 }
 0x129   :  { %92 = vrot.lane.b32.xlu1 %v90_v18, %s681_s7 }
 0x19b   :  { %v93_v19 = vpop.permute.xlu1 %92 }
 0x19c   :  { %510 = vmatmul.mubr.msk.bf16.vlgmr.msra.gmra.mrb[0].mxu0 %vm86_vm1, %v93_v19 }
 0x19d   :  { %528 = vmatprep.mubr.msk.bf16.mxu0 %vm679_vm0, %v678_v11  ;;  %525 = vmatpush3.bf16.msra.mxu0 %v55_v1 }
 0x19e   :  { %526 = vmatprep.subr.bf16.mxu0 %v678_v11 }
 0x1a1   :  { %527 = vmatpush3.bf16.msra.mxu0 %v56_v3 }
 0x26f   :  { %v131_v21 = vpop.f32.mrb[0].mxu0 }
 0x270   :  { %v137_v22 = vadd.f32 %v131_v21, %v89_v20  ;;  %v511_v23 = vpop.f32.mrb[1].mxu0 }
 0x271   :  { %v134_v24 = vpop.f32.mrb[2].mxu0 }
 0x272   :  { %577 = vtanh.f32 %v137_v22  ;;  %v512_v25 = vpop.f32.mrb[3].mxu0  ;;  %v477_v27 = vmul.f32 -1.442695, %v137_v22 }
 0x274   :  { %579 = vpow2.f32 %v477_v27 }
 0x27c   :  { %v578_v26 = vpop.eup %577 }
 0x27d   :  { %151 = vrot.lane.b32.xlu1 %v578_v26, %s677_s6 }
 0x27e   :  { %v580_v28 = vpop.eup %579 }
 0x27f   :  { %v141_v29 = vadd.f32 1.0, %v580_v28  ;;  %v57_v28 = vld [vmem:[#allocation7 + $0x60] sm:$0xff] }
 0x281   :  { %581 = vrcp.f32 %v141_v29  ;;  %v58_v29 = vld [vmem:[#allocation7 + $0x68] sm:$0xff] }
 0x28b   :  { %v582_v30 = vpop.eup %581 }
 0x28c   :  { %v149_v34 = vmul.f32 %v582_v30, %v147_v33 }
 0x2ef   :  { %v152_v31 = vpop.permute.xlu1 %151 }
 0x2f0   :  { %v154_v32 = vmul.f32 %v582_v30, %v152_v31  ;;  %v59_v31 = vld [vmem:[#allocation7 + $0x70] sm:$0xff] }
 0x2f2   :  { %156 = vrot.lane.b32.xlu1 %v154_v32, %s681_s7  ;;  %v60_v32 = vld [vmem:[#allocation7 + $0x78] sm:$0xff] }
 0x2f3   :  { %v555_v33 = vpack.c.bf16 %v60_v32, %v59_v31 }
 0x2f6   :  { %83 = vrot.lane.b32.xlu1 %v81_v17, %s681_s7 }
 0x364   :  { %v157_v35 = vpop.permute.xlu1 %156 }
 0x365   :  { %v159_v36 = vadd.f32 %v157_v35, %v149_v34 }
 0x367   :  { %583 = vtanh.f32 %v159_v36 }
 0x368   :  { %v84_v37 = vpop.permute.xlu1 %83 }
 0x369   :  { %87 = vst.msk [vmem:[#allocation3] sm:$0xff] %vm86_vm1, %v84_v37 }
 0x370   :  { %v172_v38 = vld [vmem:[#allocation3] sm:$0xff] }
 0x371   :  { %v584_v39 = vpop.eup %583  ;;  %521 = vmatprep.mubr.msk.f32.mxu1 %vm86_vm1, %v172_v38  ;;  %v484_v38 = vld [vmem:[#allocation7 + $0x81] ss:$0 sm:$0xff] }
 0x372   :  { %162 = vrot.lane.b32.xlu0 %v584_v39, %s677_s6 }
 0x3e4   :  { %v163_v46 = vpop.permute.xlu0 %162 }
 0x3e5   :  { %v165_v47 = vmul.f32 %v582_v30, %v163_v46  ;;  %v551_v30 = vpack.c.bf16 %v58_v29, %v57_v28 }
 0x3e7   :  { %167 = vrot.lane.b32.xlu0 %v165_v47, %s681_s7  ;;  %552 = vmatprep.subr.bf16.mxu1 %v551_v30 }
 0x459   :  { %v168_v48 = vpop.permute.xlu0 %167 }
 0x45a   :  { %171 = vst.msk [vmem:[#allocation3 + $0x8] sm:$0xff] %vm86_vm1, %v168_v48 }
 0x461   :  { %v173_v49 = vld [vmem:[#allocation3 + $0x8] sm:$0xff] }
 0x462   :  { %522 = vmatmul.mubr.msk.f32.vlgmr.msra.gmra.mrb[0].mxu1 %vm86_vm1, %v173_v49 }
 0x463   :  { %554 = vmatpush3.bf16.msra.mxu1 %v551_v30 }
 0x464   :  { %556 = vmatprep.subr.bf16.mxu1 %v555_v33 }
 0x467   :  { %558 = vmatpush3.bf16.msra.mxu1 %v555_v33 }
 0x535   :  { %v523_v51 = vpop.f32.mrb[0].mxu1 }
 0x536   :  { %v256_v52 = vadd.f32 %v523_v51, %v478_v50  ;;  %v250_v53 = vpop.f32.mrb[1].mxu1 }
 0x537   :  { %v251_v54 = vadd.f32 %v478_v50, %v250_v53 }
 0x539   :  { %585 = vtanh.f32 %v251_v54  ;;  %v481_v56 = vmul.f32 -1.442695, %v251_v54 }
 0x53b   :  { %587 = vpow2.f32 %v481_v56 }
 0x543   :  { %v586_v55 = vpop.eup %585 }
 0x544   :  { %270 = vrot.lane.b32.xlu1 %v586_v55, %s677_s6 }
 0x545   :  { %v588_v57 = vpop.eup %587 }
 0x546   :  { %v265_v58 = vadd.f32 1.0, %v588_v57 }
 0x548   :  { %589 = vrcp.f32 %v265_v58 }
 0x552   :  { %v590_v59 = vpop.eup %589 }
 0x5b6   :  { %v271_v60 = vpop.permute.xlu1 %270 }
 0x5b7   :  { %v273_v61 = vmul.f32 %v590_v59, %v271_v60 }
 0x5b9   :  { %591 = vtanh.f32 %v273_v61 }
 0x5c3   :  { %v592_v4 = vpop.eup %591 }
 0x5c4   :  { %276 = vrot.lane.b32.xlu0 %v592_v4, %s680_s1 }
 0x636   :  { %v277_v5 = vpop.permute.xlu0 %276 }
 0x637   :  { %v279_v6 = vmul.f32 %v590_v59, %v277_v5 }
 0x639   :  { %v287_v7 = vpack.c.bf16 %v279_v6, %v279_v6 }
 0x63b   :  { %289 = vrot.lane.b32.xlu1 %v287_v7, %s681_s7 }
 0x63f   :  { %343 = vrot.lane.b32.xlu1 %v273_v61, %s681_s7 }
 0x6ad   :  { %v290_v8 = vpop.permute.xlu1 %289 }
 0x6ae   :  { %529 = vmatmul.mubr.msk.bf16.vlgmr.msra.gmra.mrb[4].mxu0 %vm86_vm1, %v290_v8 }
 0x6b1   :  { %v344_v21 = vpop.permute.xlu1 %343 }
 0x781   :  { %v328_v9 = vpop.f32.mrb[4].mxu0 }
 0x782   :  { %v334_v10 = vadd.f32 %v328_v9, %v256_v52  ;;  %v530_v12 = vpop.f32.mrb[5].mxu0 }
 0x783   :  { %v331_v13 = vpop.f32.mrb[6].mxu0 }
 0x784   :  { %593 = vtanh.f32 %v334_v10  ;;  %v531_v14 = vpop.f32.mrb[7].mxu0  ;;  %v483_v15 = vmul.f32 -1.442695, %v334_v10 }
 0x786   :  { %595 = vpow2.f32 %v483_v15 }
 0x78e   :  { %v594_v11 = vpop.eup %593 }
 0x78f   :  { %348 = vrot.lane.b32.xlu0 %v594_v11, %s677_s6 }
 0x790   :  { %v596_v16 = vpop.eup %595 }
 0x791   :  { %v338_v17 = vadd.f32 1.0, %v596_v16 }
 0x793   :  { %597 = vrcp.f32 %v338_v17 }
 0x79d   :  { %v598_v18 = vpop.eup %597 }
 0x79e   :  { %v346_v22 = vmul.f32 %v598_v18, %v344_v21 }
 0x801   :  { %v349_v19 = vpop.permute.xlu0 %348 }
 0x802   :  { %v351_v20 = vmul.f32 %v598_v18, %v349_v19 }
 0x804   :  { %353 = vrot.lane.b32.xlu0 %v351_v20, %s681_s7 }
 0x808   :  { %281 = vrot.lane.b32.xlu0 %v279_v6, %s681_s7 }
 0x876   :  { %v354_v23 = vpop.permute.xlu0 %353 }
 0x877   :  { %v356_v24 = vadd.f32 %v354_v23, %v346_v22 }
 0x879   :  { %599 = vtanh.f32 %v356_v24 }
 0x87a   :  { %v282_v25 = vpop.permute.xlu0 %281 }
 0x87b   :  { %284 = vst.msk [vmem:[#allocation3] sm:$0xff] %vm86_vm1, %v282_v25 }
 0x882   :  { %v368_v26 = vld [vmem:[#allocation3] sm:$0xff] }
 0x883   :  { %v600_v27 = vpop.eup %599  ;;  %540 = vmatprep.mubr.msk.f32.mxu1 %vm86_vm1, %v368_v26 }
 0x884   :  { %359 = vrot.lane.b32.xlu1 %v600_v27, %s677_s6 }
 0x8f6   :  { %v360_v34 = vpop.permute.xlu1 %359 }
 0x8f7   :  { %v362_v35 = vmul.f32 %v598_v18, %v360_v34 }
 0x8f9   :  { %364 = vrot.lane.b32.xlu1 %v362_v35, %s681_s7 }
 0x96b   :  { %v365_v36 = vpop.permute.xlu1 %364 }
 0x96c   :  { %367 = vst.msk [vmem:[#allocation3 + $0x8] sm:$0xff] %vm86_vm1, %v365_v36 }
 0x973   :  { %v369_v37 = vld [vmem:[#allocation3 + $0x8] sm:$0xff] }
 0x974   :  { %541 = vmatmul.mubr.msk.f32.vlgmr.msra.gmra.mrb[2].mxu1 %vm86_vm1, %v369_v37 }
 0xa47   :  { %v542_v39 = vpop.f32.mrb[2].mxu1 }
 0xa48   :  { %v452_v40 = vadd.f32 %v542_v39, %v484_v38  ;;  %v446_v41 = vpop.f32.mrb[3].mxu1 }
 0xa49   :  { %v447_v42 = vadd.f32 %v484_v38, %v446_v41 }
 0xa4a   :  { %456 = vst [vmem:[#allocation9 + $0x8] sm:$0xff] %v452_v40 }
 0xa4b   :  { %455 = vst [vmem:[#allocation9] sm:$0xff] %v447_v42 }
 0xa4c   :  { %656 = shalt.err (!%p653_p6)
}
 0xa4d   :  { %s657_s13 = scalar_lea.hbm %s781_s2, 256 }
 0xa4e   :  { %p658_p7 = scmp.ne.s32.totalorder %s781_s2, %s657_s13  ;;  %p661_p8 = scmp.lt.u32.totalorder %s657_s13, %s781_s2 }
 0xa50   :  { %p663_p9 = pnand %p661_p8, %p658_p7 }
 0xa52   :  { %666 = shalt.err (!%p663_p9)
}
 0xa53   :  { %468 = dma.vmem_to_hbm [thread:$0]  %s463_s9, 256, %s781_s2, [#allocation6], %s674_s19, %s674_s19, %s675_s20  }
 0xa54   :  { %671 = dma.done.wait [#allocation6], 256  }
 0xa55   :  { %672 = vsyncadd [#allocation6], 4294967040 }
 0xa56   :  { %472 = vsyncpa [#allocation5], 1 }
 0xa57   :  { %473 = vsyncpa [#allocation8], 1 }
 0xa58   :  { %474 = vsyncpa [#allocation6], 1 }

</bundles_post_ra>
